<compile_context>
chip_gen: v6e
topology: v6e:2x2x1
jax: 0.10.0
libtpu: 0.0.40
codegen_flags: <defaults>
</compile_context>

<pallas_src>
import jax
import jax.numpy as jnp
from jax.experimental import pallas as pl
from jax.experimental.pallas import tpu as pltpu


_LANE = 128
# VMEM bytes per column of a (1, N) row block after sublane padding
# (8 sublanes x 4B for f32, 16 x 2B for bf16 -> 32B/column either way).
_ROW_BYTES = 32


def _round_up(x, m):
    return ((x + m - 1) // m) * m


def _vmem_budget_bytes():
    """Generation-aware VMEM budget: ~75% of per-core physical VMEM.
    v5e/v6e: 128 MiB -> 96 MiB; v7x: 64 MiB -> 48 MiB.  Falls back to the
    smallest (v7x-safe) figure if the query is unavailable."""
    cap = 64 * 1024 * 1024
    try:
        cap = int(pltpu.get_tpu_info().vmem_capacity_bytes)
    except Exception:
        pass
    return max(int(cap * 3 // 4), 32 * 1024 * 1024)


def _choose_tile(io_size, resident_bytes, bytes_per_tile_col, budget,
                 nbuf=2, max_tile=None):
    """Largest 128-multiple tile of the in_out axis such that `nbuf` streamed
    buffers (bytes_per_tile_col bytes per column each) plus the resident
    operands fit the VMEM budget."""
    io_128 = _round_up(io_size, _LANE)
    avail = max(budget - resident_bytes, nbuf * bytes_per_tile_col * _LANE)
    tile = (avail // (nbuf * bytes_per_tile_col)) // _LANE * _LANE
    tile = max(_LANE, min(tile, io_128))
    if max_tile is not None:
        tile = min(tile, max(_LANE, _round_up(max_tile, _LANE)))
    return int(tile)


# ---------------------------------------------------------------------------
# Kernels
# ---------------------------------------------------------------------------

def encoder_kernel(x_ref, w1_ref, b1_ref, w2_ref, b2_ref, w3_ref, b3_ref,
                   enc_ref, h3_ref, h1_acc):
    j = pl.program_id(0)

    @pl.when(j == 0)
    def _init():
        h1_acc[...] = jnp.zeros_like(h1_acc)

    # Partial K-reduction of encoder Linear 1: (1, tile_k) @ (tile_k, inter).
    h1_acc[...] += jnp.dot(x_ref[...], w1_ref[...],
                           preferred_element_type=jnp.float32)

    @pl.when(j == pl.num_programs(0) - 1)
    def _finalize():
        # Elementwise stays f32 (v5e VPU has no bf16 ALU); casts only at MXU.
        h1 = jnp.maximum(h1_acc[...] + b1_ref[...], 0.0)
        enc = jnp.dot(h1.astype(w2_ref.dtype), w2_ref[...],
                      preferred_element_type=jnp.float32) + b2_ref[...]
        enc_ref[...] = enc                      # pre-ReLU, as in the module
        h2 = jnp.maximum(enc, 0.0)              # decoder's leading ReLU
        h3 = jnp.dot(h2.astype(w3_ref.dtype), w3_ref[...],
                     preferred_element_type=jnp.float32) + b3_ref[...]
        h3_ref[...] = jnp.maximum(h3, 0.0).astype(h3_ref.dtype)


def decoder_kernel(h3_ref, w4_ref, b4_ref, dec_ref):
    # Independent per-tile GEMV: (1, inter) @ (inter, tile_n) + b4_tile.
    dec = jnp.dot(h3_ref[...], w4_ref[...],
                  preferred_element_type=jnp.float32) + b4_ref[...]
    dec_ref[...] = dec


# ---------------------------------------------------------------------------
# Parameters
# ---------------------------------------------------------------------------

def init_params(key, in_out_size, encoded_size, w_dtype=jnp.bfloat16,
                max_tile=None):
    """nn.Linear-style init U(-1/sqrt(fan_in), 1/sqrt(fan_in)).  Weights are
    zero-padded bf16; biases (1, fan_out_pad) f32.  w4 is repacked into
    contiguous N-tiles (num_n, inter_pad, tile_n)."""
    intermediate_size = int((in_out_size + encoded_size) * 0.5)
    inter_pad = _round_up(intermediate_size, _LANE)
    enc_pad = _round_up(encoded_size, _LANE)
    wbytes = jnp.dtype(w_dtype).itemsize
    budget = _vmem_budget_bytes()

    # Resident VMEM of the encoder call, counted with 2 buffers each (over-
    # counts when pl.Buffered(1) applies -> always safe), plus outputs/scratch.
    resident_enc = (
        2 * (_ROW_BYTES * inter_pad                 # b1
             + inter_pad * enc_pad * wbytes         # w2
             + _ROW_BYTES * enc_pad                 # b2
             + enc_pad * inter_pad * wbytes         # w3
             + _ROW_BYTES * inter_pad)              # b3
        + 2 * (_ROW_BYTES * enc_pad                 # encoded output
               + _ROW_BYTES * inter_pad)            # h3 output
        + _ROW_BYTES * inter_pad)                   # h1 accumulator scratch
    # Streamed bytes per in_out column per buffer: one w1 row + one x column.
    tile_k = _choose_tile(in_out_size, resident_enc,
                          inter_pad * wbytes + _ROW_BYTES, budget,
                          max_tile=max_tile)

    resident_dec = 2 * _ROW_BYTES * inter_pad       # h3 (resident input)
    # Streamed per column: one w4 column + b4 column + decoded output column.
    tile_n = _choose_tile(in_out_size, resident_dec,
                          inter_pad * wbytes + 2 * _ROW_BYTES, budget,
                          max_tile=max_tile)

    io_pad_k = _round_up(in_out_size, tile_k)
    io_pad_n = _round_up(in_out_size, tile_n)
    num_k = io_pad_k // tile_k
    num_n = io_pad_n // tile_n

    dims = [
        (in_out_size, intermediate_size, io_pad_k, inter_pad),   # enc linear 1
        (intermediate_size, encoded_size, inter_pad, enc_pad),   # enc linear 2
        (encoded_size, intermediate_size, enc_pad, inter_pad),   # dec linear 1
        (intermediate_size, in_out_size, inter_pad, io_pad_n),   # dec linear 2
    ]
    params = []
    for fan_in, fan_out, fi_pad, fo_pad in dims:
        key, kw, kb = jax.random.split(key, 3)
        bound = 1.0 / (fan_in ** 0.5)
        w = jax.random.uniform(kw, (fan_in, fan_out), jnp.float32, -bound, bound)
        b = jax.random.uniform(kb, (fan_out,), jnp.float32, -bound, bound)
        # Padded rows/cols are ZERO so the padded matmul chain equals the
        # unpadded one on the real lanes.
        w_p = jnp.zeros((fi_pad, fo_pad), w_dtype).at[:fan_in, :fan_out].set(
            w.astype(w_dtype))
        b_p = jnp.zeros((1, fo_pad), jnp.float32).at[0, :fan_out].set(b)
        params.append((w_p, b_p))

    # Repack w4 into contiguous N-tiles so each streamed tile is one
    # contiguous DMA (no short strided rows; matters most on v5e).
    w4, b4 = params[3]
    w4_t = w4.reshape(inter_pad, num_n, tile_n).transpose(1, 0, 2)
    params[3] = (w4_t, b4)

    sizes = dict(in_out_size=in_out_size, encoded_size=encoded_size,
                 intermediate_size=intermediate_size,
                 inter_pad=inter_pad, enc_pad=enc_pad,
                 io_pad_k=io_pad_k, io_pad_n=io_pad_n,
                 tile_k=tile_k, tile_n=tile_n, num_k=num_k, num_n=num_n,
                 budget=budget, resident_enc=resident_enc,
                 resident_dec=resident_dec)
    return params, sizes


# ---------------------------------------------------------------------------
# Forward
# ---------------------------------------------------------------------------

def _spec(shape, index_map, nbuf=None):
    if nbuf is None:
        return pl.BlockSpec(shape, index_map)
    return pl.BlockSpec(shape, index_map, pipeline_mode=pl.Buffered(nbuf))


def _forward_impl(x_pad, params, sizes, buffered):
    (w1, b1), (w2, b2), (w3, b3), (w4t, b4) = params
    inter_pad, enc_pad = sizes["inter_pad"], sizes["enc_pad"]
    tile_k, tile_n = sizes["tile_k"], sizes["tile_n"]
    num_k, num_n = sizes["num_k"], sizes["num_n"]
    budget = sizes["budget"]
    wbytes = jnp.dtype(w1.dtype).itemsize

    rep = lambda j: (0, 0)                       # resident (index never moves)
    res_buf = 1 if buffered else None            # single buffer for residents
    # Triple-buffer the streamed weights only if the extra buffer still fits.
    stream_k = tile_k * (inter_pad * wbytes + _ROW_BYTES)
    stream_n = tile_n * (inter_pad * wbytes + 2 * _ROW_BYTES)
    w1_buf = 3 if (buffered and sizes["resident_enc"] + 3 * stream_k <= budget) else None
    w4_buf = 3 if (buffered and sizes["resident_dec"] + 3 * stream_n <= budget) else None

    # --- Call 1: encoder (w1 K-stream) + small w2/w3 layers -> encoded, h3 ---
    enc_out, h3 = pl.pallas_call(
        encoder_kernel,
        grid=(num_k,),
        in_specs=[
            pl.BlockSpec((1, tile_k), lambda j: (0, j)),            # x tiles
            _spec((tile_k, inter_pad), lambda j: (j, 0), w1_buf),   # w1 stream
            _spec((1, inter_pad), rep, res_buf),                    # b1
            _spec((inter_pad, enc_pad), rep, res_buf),              # w2
            _spec((1, enc_pad), rep, res_buf),                      # b2
            _spec((enc_pad, inter_pad), rep, res_buf),              # w3
            _spec((1, inter_pad), rep, res_buf),                    # b3
        ],
        out_specs=(
            pl.BlockSpec((1, enc_pad), rep),                        # encoded
            pl.BlockSpec((1, inter_pad), rep),                      # h3 (bf16)
        ),
        out_shape=(
            jax.ShapeDtypeStruct((1, enc_pad), jnp.float32),
            jax.ShapeDtypeStruct((1, inter_pad), w1.dtype),
        ),
        scratch_shapes=[pltpu.VMEM((1, inter_pad), jnp.float32)],   # h1 acc
        compiler_params=pltpu.CompilerParams(
            dimension_semantics=("arbitrary",),   # K-reduction (shared acc)
            vmem_limit_bytes=budget,
        ),
    )(x_pad, w1, b1, w2, b2, w3, b3)

    # --- Call 2: decoder output layer (w4 N-stream, independent tiles) ------
    dec_pad = pl.pallas_call(
        decoder_kernel,
        grid=(num_n,),
        in_specs=[
            _spec((1, inter_pad), rep, res_buf),                        # h3
            _spec((None, inter_pad, tile_n), lambda j: (j, 0, 0), w4_buf),  # w4
            pl.BlockSpec((1, tile_n), lambda j: (0, j)),                # b4
        ],
        out_specs=pl.BlockSpec((1, tile_n), lambda j: (0, j)),          # decoded
        out_shape=jax.ShapeDtypeStruct((1, sizes["io_pad_n"]), jnp.float32),
        compiler_params=pltpu.CompilerParams(
            # Independent output tiles: lets v7x shard the dominant w4
            # stream across both TensorCores.
            dimension_semantics=("parallel",),
            vmem_limit_bytes=budget,
        ),
    )(h3, w4t, b4)

    return dec_pad, enc_out


def autoencoder_forward(x, params, sizes):
    """x: any shape; flattened to (1, -1) like the PyTorch forward.
    Returns (decoded (1, in_out), encoded (1, encoded))."""
    io = sizes["in_out_size"]
    w_dtype = params[0][0].dtype
    x_flat = x.reshape(1, -1)
    assert x_flat.shape[1] == io, "input size does not match in_out_size"
    x_pad = jnp.zeros((1, sizes["io_pad_k"]), w_dtype).at[:, :io].set(
        x_flat.astype(w_dtype))

    try:
        dec_pad, enc_out = _forward_impl(x_pad, params, sizes, buffered=True)
        dec_pad = jax.block_until_ready(dec_pad)
    except Exception:
        # pipeline_mode=pl.Buffered unsupported on this jax build/backend:
        # retry with default double-buffering (identical numerics).
        dec_pad, enc_out = _forward_impl(x_pad, params, sizes, buffered=False)

    return dec_pad[:, :io], enc_out[:, :sizes["encoded_size"]]


def _reference_forward(x, params, sizes):
    """Pure-JAX reference with the same bf16 weights / f32 accumulation."""
    (w1, b1), (w2, b2), (w3, b3), (w4t, b4) = params
    io = sizes["in_out_size"]
    inter_pad, io_pad_n = sizes["inter_pad"], sizes["io_pad_n"]
    w4 = w4t.transpose(1, 0, 2).reshape(inter_pad, io_pad_n)
    x_pad = jnp.zeros((1, sizes["io_pad_k"]), w1.dtype).at[:, :io].set(
        x.reshape(1, -1).astype(w1.dtype))
    h = jnp.maximum(jnp.dot(x_pad, w1, preferred_element_type=jnp.float32) + b1, 0.0)
    enc = jnp.dot(h.astype(w1.dtype), w2, preferred_element_type=jnp.float32) + b2
    h = jnp.maximum(enc, 0.0)
    h = jnp.maximum(jnp.dot(h.astype(w1.dtype), w3,
                            preferred_element_type=jnp.float32) + b3, 0.0)
    dec = jnp.dot(h.astype(w1.dtype), w4, preferred_element_type=jnp.float32) + b4
    return dec[:, :io], enc[:, :sizes["encoded_size"]]


if __name__ == "__main__":
    key = jax.random.PRNGKey(0)
    k_x, k_p = jax.random.split(key)

    # Module-consistent small shapes: input (2, 128) -> in_out_size = 256
    # (forward does input.view(1, -1)); encoded_size = 64 -> intermediate 160.
    x = jax.random.normal(k_x, (2, 128), dtype=jnp.float32)
    in_out_size = x.size
    encoded_size = 64

    # max_tile=128 forces multi-step grids at this tiny demo size so the
    # streaming / accumulation paths are exercised; production sizes use the
    # VMEM-budget-derived (much larger) tile.
    params, sizes = init_params(k_p, in_out_size, encoded_size, max_tile=128)

    decoded, encoded = autoencoder_forward(x, params, sizes)
    decoded = jax.block_until_ready(decoded)
    encoded = jax.block_until_ready(encoded)

    # Sanity check against a pure-JAX reference (same bf16 weights, f32 accum).
    dec_ref, enc_ref = _reference_forward(x, params, sizes)
    assert decoded.shape == (1, in_out_size)
    assert encoded.shape == (1, encoded_size)
    assert jnp.allclose(decoded, dec_ref, atol=1e-2, rtol=1e-2), \
        float(jnp.max(jnp.abs(decoded - dec_ref)))
    assert jnp.allclose(encoded, enc_ref, atol=1e-2, rtol=1e-2), \
        float(jnp.max(jnp.abs(encoded - enc_ref)))

    print("KERNEL_OK")
</pallas_src>

<mosaic_0001>
module attributes {stable_mosaic.version = 11 : i64} {
  func.func @encoder_kernel(%arg0: i32, %arg1: memref<1x128xbf16, #tpu.memory_space<vmem>>, %arg2: memref<128x256xbf16, #tpu.memory_space<vmem>>, %arg3: memref<1x256xf32, #tpu.memory_space<vmem>>, %arg4: memref<256x128xbf16, #tpu.memory_space<vmem>>, %arg5: memref<1x128xf32, #tpu.memory_space<vmem>>, %arg6: memref<128x256xbf16, #tpu.memory_space<vmem>>, %arg7: memref<1x256xf32, #tpu.memory_space<vmem>>, %arg8: memref<1x128xf32, #tpu.memory_space<vmem>>, %arg9: memref<1x256xbf16, #tpu.memory_space<vmem>>, %arg10: memref<1x256xf32, #tpu.memory_space<vmem>>) attributes {dimension_semantics = [#tpu.dimension_semantics<arbitrary>], iteration_bounds = array<i64: 2>, scalar_prefetch = 0 : i64, scratch_operands = 1 : i64, tpu.core_type = #tpu.core_type<tc>, window_params = [{transform_indices = @transform_0, window_bounds = array<i64: 1, 128>}, {transform_indices = @transform_1, window_bounds = array<i64: 128, 256>}, {pipeline_mode = #tpu.pipeline_mode<synchronous>, transform_indices = @transform_2, window_bounds = array<i64: 1, 256>}, {pipeline_mode = #tpu.pipeline_mode<synchronous>, transform_indices = @transform_3, window_bounds = array<i64: 256, 128>}, {pipeline_mode = #tpu.pipeline_mode<synchronous>, transform_indices = @transform_4, window_bounds = array<i64: 1, 128>}, {pipeline_mode = #tpu.pipeline_mode<synchronous>, transform_indices = @transform_5, window_bounds = array<i64: 128, 256>}, {pipeline_mode = #tpu.pipeline_mode<synchronous>, transform_indices = @transform_6, window_bounds = array<i64: 1, 256>}, {pipeline_mode = #tpu.pipeline_mode<synchronous>, transform_indices = @transform_7, window_bounds = array<i64: 1, 128>}, {pipeline_mode = #tpu.pipeline_mode<synchronous>, transform_indices = @transform_8, window_bounds = array<i64: 1, 256>}]} {
    %c0_i32 = arith.constant 0 : i32
    %0 = arith.cmpi eq, %arg0, %c0_i32 : i32
    %1 = arith.extui %0 : i1 to i32
    %c0_i32_0 = arith.constant 0 : i32
    %2 = arith.cmpi ne, %1, %c0_i32_0 : i32
    scf.if %2 {
      %cst_9 = arith.constant 0.000000e+00 : f32
      %12 = vector.broadcast %cst_9 : f32 to vector<1x256xf32>
      %c0_10 = arith.constant 0 : index
      %c0_11 = arith.constant 0 : index
      %13 = vector.load %arg10[%c0_10, %c0_11] : memref<1x256xf32, #tpu.memory_space<vmem>>, vector<1x256xf32>
      tpu.vector_store %arg10[%c0_10, %c0_11], %12 {strides = array<i32>} : memref<1x256xf32, #tpu.memory_space<vmem>>, vector<1x256xf32>,
    } else {
    }
    %c0 = arith.constant 0 : index
    %c0_1 = arith.constant 0 : index
    %3 = vector.load %arg10[%c0, %c0_1] : memref<1x256xf32, #tpu.memory_space<vmem>>, vector<1x256xf32>
    %c0_2 = arith.constant 0 : index
    %c0_3 = arith.constant 0 : index
    %4 = vector.load %arg1[%c0_2, %c0_3] : memref<1x128xbf16, #tpu.memory_space<vmem>>, vector<1x128xbf16>
    %c0_4 = arith.constant 0 : index
    %c0_5 = arith.constant 0 : index
    %5 = vector.load %arg2[%c0_4, %c0_5] : memref<128x256xbf16, #tpu.memory_space<vmem>>, vector<128x256xbf16>
    %cst = arith.constant dense<0.000000e+00> : vector<1x256xf32>
    %6 = tpu.matmul %4, %5, %cst {dimension_numbers = #tpu.dot_dimension_numbers<[1], [0], [0], [1], [0, 0, 1, 1], [], []>} : vector<1x128xbf16>, vector<128x256xbf16>, vector<1x256xf32> -> vector<1x256xf32>
    %7 = arith.addf %3, %6 : vector<1x256xf32>
    %c0_6 = arith.constant 0 : index
    %c0_7 = arith.constant 0 : index
    %8 = vector.load %arg10[%c0_6, %c0_7] : memref<1x256xf32, #tpu.memory_space<vmem>>, vector<1x256xf32>
    tpu.vector_store %arg10[%c0_6, %c0_7], %7 {strides = array<i32>} : memref<1x256xf32, #tpu.memory_space<vmem>>, vector<1x256xf32>,
    %c1_i32 = arith.constant 1 : i32
    %9 = arith.cmpi eq, %arg0, %c1_i32 : i32
    %10 = arith.extui %9 : i1 to i32
    %c0_i32_8 = arith.constant 0 : i32
    %11 = arith.cmpi ne, %10, %c0_i32_8 : i32
    scf.if %11 {
      %c0_9 = arith.constant 0 : index
      %c0_10 = arith.constant 0 : index
      %12 = vector.load %arg10[%c0_9, %c0_10] : memref<1x256xf32, #tpu.memory_space<vmem>>, vector<1x256xf32>
      %c0_11 = arith.constant 0 : index
      %c0_12 = arith.constant 0 : index
      %13 = vector.load %arg3[%c0_11, %c0_12] : memref<1x256xf32, #tpu.memory_space<vmem>>, vector<1x256xf32>
      %14 = arith.addf %12, %13 : vector<1x256xf32>
      %cst_13 = arith.constant 0.000000e+00 : f32
      %15 = vector.broadcast %cst_13 : f32 to vector<1x256xf32>
      %16 = arith.maximumf %14, %15 : vector<1x256xf32>
      %17 = arith.truncf %16 : vector<1x256xf32> to vector<1x256xbf16>
      %c0_14 = arith.constant 0 : index
      %c0_15 = arith.constant 0 : index
      %18 = vector.load %arg4[%c0_14, %c0_15] : memref<256x128xbf16, #tpu.memory_space<vmem>>, vector<256x128xbf16>
      %cst_16 = arith.constant dense<0.000000e+00> : vector<1x128xf32>
      %19 = tpu.matmul %17, %18, %cst_16 {dimension_numbers = #tpu.dot_dimension_numbers<[1], [0], [0], [1], [0, 0, 1, 1], [], []>} : vector<1x256xbf16>, vector<256x128xbf16>, vector<1x128xf32> -> vector<1x128xf32>
      %c0_17 = arith.constant 0 : index
      %c0_18 = arith.constant 0 : index
      %20 = vector.load %arg5[%c0_17, %c0_18] : memref<1x128xf32, #tpu.memory_space<vmem>>, vector<1x128xf32>
      %21 = arith.addf %19, %20 : vector<1x128xf32>
      %c0_19 = arith.constant 0 : index
      %c0_20 = arith.constant 0 : index
      %22 = vector.load %arg8[%c0_19, %c0_20] : memref<1x128xf32, #tpu.memory_space<vmem>>, vector<1x128xf32>
      tpu.vector_store %arg8[%c0_19, %c0_20], %21 {strides = array<i32>} : memref<1x128xf32, #tpu.memory_space<vmem>>, vector<1x128xf32>,
      %cst_21 = arith.constant 0.000000e+00 : f32
      %23 = vector.broadcast %cst_21 : f32 to vector<1x128xf32>
      %24 = arith.maximumf %21, %23 : vector<1x128xf32>
      %25 = arith.truncf %24 : vector<1x128xf32> to vector<1x128xbf16>
      %c0_22 = arith.constant 0 : index
      %c0_23 = arith.constant 0 : index
      %26 = vector.load %arg6[%c0_22, %c0_23] : memref<128x256xbf16, #tpu.memory_space<vmem>>, vector<128x256xbf16>
      %cst_24 = arith.constant dense<0.000000e+00> : vector<1x256xf32>
      %27 = tpu.matmul %25, %26, %cst_24 {dimension_numbers = #tpu.dot_dimension_numbers<[1], [0], [0], [1], [0, 0, 1, 1], [], []>} : vector<1x128xbf16>, vector<128x256xbf16>, vector<1x256xf32> -> vector<1x256xf32>
      %c0_25 = arith.constant 0 : index
      %c0_26 = arith.constant 0 : index
      %28 = vector.load %arg7[%c0_25, %c0_26] : memref<1x256xf32, #tpu.memory_space<vmem>>, vector<1x256xf32>
      %29 = arith.addf %27, %28 : vector<1x256xf32>
      %cst_27 = arith.constant 0.000000e+00 : f32
      %30 = vector.broadcast %cst_27 : f32 to vector<1x256xf32>
      %31 = arith.maximumf %29, %30 : vector<1x256xf32>
      %32 = arith.truncf %31 : vector<1x256xf32> to vector<1x256xbf16>
      %c0_28 = arith.constant 0 : index
      %c0_29 = arith.constant 0 : index
      %33 = vector.load %arg9[%c0_28, %c0_29] : memref<1x256xbf16, #tpu.memory_space<vmem>>, vector<1x256xbf16>
      tpu.vector_store %arg9[%c0_28, %c0_29], %32 {strides = array<i32>} : memref<1x256xbf16, #tpu.memory_space<vmem>>, vector<1x256xbf16>,
    } else {
    }
    return
  }
  func.func @transform_0(%arg0: i32) -> (i32, i32) {
    %c0_i32 = arith.constant 0 : i32
    %c0_i32_0 = arith.constant 0 : i32
    return %c0_i32, %arg0 : i32, i32
  }
  func.func @transform_1(%arg0: i32) -> (i32, i32) {
    %c0_i32 = arith.constant 0 : i32
    %c0_i32_0 = arith.constant 0 : i32
    return %arg0, %c0_i32 : i32, i32
  }
  func.func @transform_2(%arg0: i32) -> (i32, i32) {
    %c0_i32 = arith.constant 0 : i32
    %c0_i32_0 = arith.constant 0 : i32
    %c0_i32_1 = arith.constant 0 : i32
    return %c0_i32, %c0_i32_0 : i32, i32
  }
  func.func @transform_3(%arg0: i32) -> (i32, i32) {
    %c0_i32 = arith.constant 0 : i32
    %c0_i32_0 = arith.constant 0 : i32
    %c0_i32_1 = arith.constant 0 : i32
    return %c0_i32, %c0_i32_0 : i32, i32
  }
  func.func @transform_4(%arg0: i32) -> (i32, i32) {
    %c0_i32 = arith.constant 0 : i32
    %c0_i32_0 = arith.constant 0 : i32
    %c0_i32_1 = arith.constant 0 : i32
    return %c0_i32, %c0_i32_0 : i32, i32
  }
  func.func @transform_5(%arg0: i32) -> (i32, i32) {
    %c0_i32 = arith.constant 0 : i32
    %c0_i32_0 = arith.constant 0 : i32
    %c0_i32_1 = arith.constant 0 : i32
    return %c0_i32, %c0_i32_0 : i32, i32
  }
  func.func @transform_6(%arg0: i32) -> (i32, i32) {
    %c0_i32 = arith.constant 0 : i32
    %c0_i32_0 = arith.constant 0 : i32
    %c0_i32_1 = arith.constant 0 : i32
    return %c0_i32, %c0_i32_0 : i32, i32
  }
  func.func @transform_7(%arg0: i32) -> (i32, i32) {
    %c0_i32 = arith.constant 0 : i32
    %c0_i32_0 = arith.constant 0 : i32
    %c0_i32_1 = arith.constant 0 : i32
    return %c0_i32, %c0_i32_0 : i32, i32
  }
  func.func @transform_8(%arg0: i32) -> (i32, i32) {
    %c0_i32 = arith.constant 0 : i32
    %c0_i32_0 = arith.constant 0 : i32
    %c0_i32_1 = arith.constant 0 : i32
    return %c0_i32, %c0_i32_0 : i32, i32
  }
}

</mosaic_0001>

<bundles_post_ra>
// kernel: tpu_custom_call.1
= control target key start
LH: loop header
LB: loop body
LE: loop exit
PB: predicated region body
PF: predicated region fallthrough
CT: control target
= control target key end

     0   :  { %s1824_s0 = inlined_call_operand.hbm [shape: bf16[1,256], index: 0, kind: input, shape index: {}]   ;;  %s1825_s1 = inlined_call_operand.hbm [shape: bf16[256,256], index: 1, kind: input, shape index: {}]   ;;  %s1826_s2 = inlined_call_operand.vmem [shape: f32[1,256], index: 2, kind: input, shape index: {}]   ;;  %s1827_s3 = inlined_call_operand.hbm [shape: bf16[256,128], index: 3, kind: input, shape index: {}]   ;;  %s1828_s4 = inlined_call_operand.vmem [shape: f32[1,128], index: 4, kind: input, shape index: {}]   ;;  %s1829_s5 = inlined_call_operand.hbm [shape: bf16[128,256], index: 5, kind: input, shape index: {}]   ;;  %s1830_s6 = inlined_call_operand.vmem [shape: f32[1,256], index: 6, kind: input, shape index: {}]   ;;  %s1831_s7 = inlined_call_operand.hbm [shape: f32[1,128], index: 7, kind: output, shape index: {0}]   ;;  %s1832_s8 = inlined_call_operand.hbm [shape: bf16[1,256], index: 8, kind: output, shape index: {1}]  }
   0x1   :  { %1837 = sst [smem:[#allocation20_spill]] %s1824_s0 }
   0x2   :  { %14 = vsyncpa [#allocation4], 0 }
   0x3   :  { %16 = vsyncpa [#allocation4 + $0x1], 0 }
   0x4   :  { %17 = vsyncpa [#allocation7], 0 }
   0x5   :  { %19 = vsyncpa [#allocation7 + $0x1], 0 }
   0x6   :  { %20 = vsyncpa [#allocation10], 0 }
   0x7   :  { %21 = vsyncpa [#allocation5], 0 }
   0x8   :  { %22 = vsyncpa [#allocation13], 0  ;;  %s1558_s27 = smov 0   ;;  %s1560_s28 = smov 0  }
   0x9   :  { %s1562_s29 = smov 0   ;;  %s1564_s30 = smov 0  }
   0xa LB: > { %s1577_s9 = sadd.s32 4294967295, %s1497_s30   ;;  %p48_p0 = scmp.ne.s32.totalorder %s1489_s28, %s1485_s27  ;;  %s1497_s30 = sphi %s1564_s30, %s1856_s30   ;;  %s1493_s29 = sphi %s1562_s29, %s1855_s29   ;;  %s1489_s28 = sphi %s1560_s28, %s1854_s28   ;;  %s1485_s27 = sphi %s1558_s27, %s1853_s27  }
   0xb   : > { %p1833_p1 = scmp.eq.s32.totalorder %s1577_s9, 0  ;;  %p1042_p2 = scmp.ge.s32.totalorder %s1497_s30, 1 }
   0xc   : > { %p232_p3 = scmp.lt.s32.totalorder %s1497_s30, 3  ;;  %s1499_s12 = smov [#allocation8]  }
   0xd   : > { %p1586_p5 = por %p1833_p1, %p48_p0  ;;  %s247_s13 = sshll.u32 %s1499_s12, 4  ;;  %s248_s13 = int_to_ptr.vmem [resolvable:$true] %s247_s13 }
   0xe   : > { %p1590_p6 = pnand %p1042_p2, %p232_p3  ;;  %s1500_s15 = smov [#allocation9]  }
   0xf   : > { %s1838_s10 = scalar_select %p1586_p5, 1, 0 }
  0x10   : > { %p1156_p7 = pneg %p1590_p6  ;;  %s263_s16 = sshll.u32 %s1500_s15, 4  ;;  %s264_s16 = int_to_ptr.vmem [resolvable:$true] %s263_s16 }
  0x11   : > { %s1298_s17 = scalar_lea.vmem %s248_s13, 2048  ;;  %p1306_p13 = scmp.lt.s32.totalorder %s248_s13, %s248_s13 }
  0x12   : > { %p1598_p8 = pnand %p1156_p7, %p1833_p1  ;;  %p1299_p10 = scmp.ne.s32.totalorder %s248_s13, %s1298_s17 }
  0x13   : > { %p1307_p0 = scmp.lt.s32.totalorder %s1298_s17, %s1298_s17 }
  0x14   : > { %p1289_p9 = pneg %p1598_p8 }
  0x15   : > { %p1308_p2 = por %p1307_p0, %p1306_p13 }
  0x16   : > { %p1301_p11 = pnand %p1299_p10, %p1289_p9 }
  0x18   : > { %p1302_p12 = pneg %p1301_p11 }
  0x1a   : > { %p1309_p3 = pnand %p1308_p2, %p1302_p12 }
  0x1c   : > { %1312 = shalt.err (!%p1309_p3)
}
  0x1d   : > { %s1501_s18 = smov 64   ;;  %s1502_s19 = smov 4  }
  0x1e   : > { %1159 = dma.hbm_to_vmem [thread:$0]  (!%p1598_p8), %s1827_s3, 2048, %s248_s13, [#allocation7], %s1501_s18, %s1501_s18, %s1502_s19  }
  0x1f   : > { %s1324_s22 = scalar_lea.vmem %s264_s16, 2048  ;;  %p1332_p4 = scmp.lt.s32.totalorder %s264_s16, %s264_s16 }
  0x20   : > { %p1325_p7 = scmp.ne.s32.totalorder %s264_s16, %s1324_s22  ;;  %p1333_p1 = scmp.lt.s32.totalorder %s1324_s22, %s1324_s22 }
  0x22   : > { %p1327_p10 = pnand %p1325_p7, %p1289_p9  ;;  %p1334_p13 = por %p1333_p1, %p1332_p4 }
  0x24   : > { %p1328_p11 = pneg %p1327_p10 }
  0x26   : > { %p1335_p12 = pnand %p1334_p13, %p1328_p11 }
  0x28   : > { %1338 = shalt.err (!%p1335_p12)
}
  0x29   : > { %s1834_s23 = smov 128   ;;  %s1835_s24 = smov 8  }
  0x2a   : > { %1162 = dma.hbm_to_vmem [thread:$0]  (!%p1598_p8), %s1829_s5, 2048, %s264_s16, [#allocation10], %s1834_s23, %s1834_s23, %s1835_s24  }
  0x2b   : > { %s1624_s27 = sadd.s32 1, %s1497_s30   ;;  %s35_s13 = sadd.s32 1, %s1493_s29 }
  0x2c   : > { %s32_s12 = ssub.s32 %s1497_s30, %s1624_s27  ;;  %p42_p4 = scmp.ne.s32.totalorder %s1493_s29, %s1489_s28 }
  0x2d   : > { %p33_p1 = scmp.eq.s32.totalorder %s32_s12, 0  ;;  %p43_p9 = scmp.eq.s32.totalorder %s1497_s30, 0 }
  0x2e   : > { %p1172_p2 = scmp.lt.s32.totalorder %s1497_s30, 2  ;;  %s1637_s14 = sand.u32 1, %s1493_s29  }
  0x2f   : > { %s1633_s15 = scalar_select %p33_p1, %s1493_s29, %s35_s13  }
  0x30   : > { %p44_p0 = por %p43_p9, %p42_p4  ;;  %s1046_s17 = sshll.u32 %s1497_s30, 4 }
  0x31   : > { %s1841_s0 = sld [smem:[#allocation20_spill]]  ;;  %s283_s20 = scalar_lea.vmem [#allocation3], %s1637_s14 }
  0x32   : > { %s290_s21 = sshll.u32 %s283_s20, 4  ;;  %p1648_p8 = pnand %p1172_p2, %p44_p0  ;;  %s1646_s21 = int_to_ptr.vmem [resolvable:$true] %s290_s21 }
  0x33   : > { %s1047_s25 = sshll.u32 %s1637_s14, 7  ;;  %s281_s12 = scalar_lea.sflag [#allocation4], %s1637_s14 }
  0x34   : > { %p1341_p7 = pneg %p1648_p8 }
  0x37   : > { %s1643_s19 = scalar_lea.hbm %s1841_s0, %s1046_s17  ;;  %s1344_s18 = scalar_lea.hbm %s1841_s0, 32 }
  0x38   : > { %s1339_s13 = scalar_lea.hbm %s1643_s19, 16  ;;  %p1345_p13 = scmp.lt.s32.totalorder %s1643_s19, %s1841_s0 }
  0x39   : > { %p1340_p3 = scmp.ne.s32.totalorder %s1643_s19, %s1339_s13  ;;  %p1346_p12 = scmp.lt.s32.totalorder %s1344_s18, %s1339_s13 }
  0x3b   : > { %p1342_p10 = pnand %p1341_p7, %p1340_p3  ;;  %p1347_p1 = por %p1346_p12, %p1345_p13 }
  0x3d   : > { %p1343_p11 = pneg %p1342_p10 }
  0x3f   : > { %p1348_p4 = pnand %p1347_p1, %p1343_p11 }
  0x41   : > { %1351 = shalt.err (!%p1348_p4)
}
  0x42   : > { %s1352_s24 = scalar_lea.vmem %s1646_s21, 16  ;;  %s1505_s17 = smov [#allocation3]  }
  0x43   : > { %p1353_p9 = scmp.ne.s32.totalorder %s1646_s21, %s1352_s24  ;;  %s1357_s16 = sshll.u32 %s1505_s17, 4  ;;  %s1358_s16 = int_to_ptr.vmem [resolvable:$false] %s1357_s16 }
  0x44   : > { %s1359_s26 = scalar_lea.vmem %s1358_s16, 32  ;;  %p1360_p3 = scmp.lt.s32.totalorder %s1646_s21, %s1358_s16 }
  0x45   : > { %p1355_p0 = pnand %p1353_p9, %p1341_p7  ;;  %p1361_p10 = scmp.lt.s32.totalorder %s1359_s26, %s1352_s24 }
  0x47   : > { %p1356_p2 = pneg %p1355_p0  ;;  %p1362_p5 = por %p1361_p10, %p1360_p3 }
  0x49   : > { %p1363_p13 = pnand %p1362_p5, %p1356_p2 }
  0x4b   : > { %1366 = shalt.err (!%p1363_p13)
}
  0x4c   : > { %1166 = dma.hbm_to_vmem [thread:$0]  (!%p1648_p8), %s1643_s19, 16, %s1646_s21, %s281_s12  }
  0x4d   : > { %s301_s23 = scalar_lea.vmem [#allocation6], %s1047_s25  ;;  %s1113_s18 = sshll.u32 %s1497_s30, 11 }
  0x4e   : > { %s309_s13 = sshll.u32 %s301_s23, 4  ;;  %s1687_s26 = scalar_lea.hbm %s1825_s1, %s1113_s18  ;;  %s1681_s13 = int_to_ptr.vmem [resolvable:$true] %s309_s13 }
  0x4f   : > { %s1843_s17 = sand.u32 1, %s1497_s30   ;;  %s1367_s0 = scalar_lea.hbm %s1687_s26, 2048 }
  0x50   : > { %s298_s16 = scalar_lea.sflag [#allocation7], %s1843_s17  ;;  %p1368_p5 = scmp.ne.s32.totalorder %s1687_s26, %s1367_s0 }
  0x51   : > { %s1372_s21 = scalar_lea.hbm %s1825_s1, 4096  ;;  %p1373_p1 = scmp.lt.s32.totalorder %s1687_s26, %s1825_s1 }
  0x52   : > { %p1370_p11 = pnand %p1368_p5, %p1341_p7  ;;  %p1374_p4 = scmp.lt.s32.totalorder %s1372_s21, %s1367_s0 }
  0x54   : > { %p1371_p12 = pneg %p1370_p11  ;;  %p1375_p9 = por %p1374_p4, %p1373_p1 }
  0x56   : > { %p1376_p0 = pnand %p1375_p9, %p1371_p12 }
  0x58   : > { %1379 = shalt.err (!%p1376_p0)
}
  0x59   : > { %s1380_s30 = scalar_lea.vmem %s1681_s13, 2048  ;;  %s1506_s23 = smov [#allocation6]  }
  0x5a   : > { %p1381_p2 = scmp.ne.s32.totalorder %s1681_s13, %s1380_s30  ;;  %s1385_s18 = sshll.u32 %s1506_s23, 4  ;;  %s1386_s18 = int_to_ptr.vmem [resolvable:$false] %s1385_s18 }
  0x5b   : > { %s1387_s20 = scalar_lea.vmem %s1386_s18, 4096  ;;  %p1388_p13 = scmp.lt.s32.totalorder %s1681_s13, %s1386_s18 }
  0x5c   : > { %p1383_p3 = pnand %p1381_p2, %p1341_p7  ;;  %p1389_p5 = scmp.lt.s32.totalorder %s1387_s20, %s1380_s30 }
  0x5e   : > { %p1384_p10 = pneg %p1383_p3  ;;  %p1390_p11 = por %p1389_p5, %p1388_p13 }
  0x60   : > { %p1391_p1 = pnand %p1390_p11, %p1384_p10 }
  0x62   : > { %1394 = shalt.err (!%p1391_p1)
}
  0x63   : > { %s1844_s0 = smov 8   ;;  %s1845_s24 = smov 128  }
  0x64   : > { %1169 = dma.hbm_to_vmem [thread:$0]  (!%p1648_p8), %s1687_s26, 2048, %s1681_s13, %s298_s16, %s1845_s24, %s1845_s24, %s1844_s0  }
  0x65   : > { %321 = sbr.rel (%p1590_p6) target bundleno = 835 (0x343), region = 48  ;;  %s1719_s17 = sand.u32 (!%p1590_p6), 1, %s1489_s28  }
  0x66   : > { %s324_s14 = scalar_lea.sflag (!%p1590_p6), [#allocation4], %s1719_s17  ;;  %s326_s19 = scalar_lea.vmem (!%p1590_p6), [#allocation3], %s1719_s17 }
  0x67   : > { %p1846_p7 = scmp.ne.s32.totalorder (!%p1590_p6), %s1838_s10, 0 }
  0x6a   : > { %1460 = dma.done.wait (%p1846_p7), %s324_s14, 16  }
  0x6b   : > { %1462 = vsyncadd (%p1846_p7), %s324_s14, 4294967280  ;;  %s331_s22 = sand.u32 1, %s1577_s9   ;;  %s1052_s13 = sshll.u32 %s1719_s17, 7 }
  0x6c   : > { %s332_s11 = scalar_lea.sflag [#allocation7], %s331_s22  ;;  %s1729_s26 = scalar_lea.vmem [#allocation6], %s1052_s13 }
  0x6d   : > { %1464 = dma.done.wait (%p1846_p7), %s332_s11, 2048  }
  0x6e   : > { %1466 = vsyncadd (%p1846_p7), %s332_s11, 4294965248  ;;  %p1847_p6 = scmp.eq.s32.totalorder %s1577_s9, 0 }
  0x70   : > { %1468 = dma.done.wait (%p1847_p6), [#allocation7], 2048   ;;  %p1848_p8 = pmov %p1847_p6 }
  0x71   : > { %p1849_p12 = pmov %p1847_p6 }
  0x72   : > { %1470 = vsyncadd (%p1848_p8), [#allocation7], 4294965248 }
  0x73   : > { %1472 = dma.done.wait (%p1849_p12), [#allocation10], 2048   ;;  %p1850_p4 = pmov %p1847_p6 }
  0x74   : > { %p1851_p9 = scmp.ne.s32.totalorder %s1577_s9, 0 }
  0x75   : > { %1474 = vsyncadd (%p1850_p4), [#allocation10], 4294965248 }
  0x76   : > { %380 = sbr.rel (%p1851_p9) target bundleno = 127 (0x7f), region = 68 }
  0x7b   : > { %v381_v0 = vlaneseq  ;;  %v1507_v1 = vmov 0.0  }
  0x7d   : > { %vm383_vm0 = vcmp.lt.s32.totalorder %v381_v0, 256 }
  0x7e   : > { %385 = vst.msk [vmem:[#allocation2] sm:$0x3] %vm383_vm0, %v1507_v1 }
  0x7f PF: > { %v1223_v2 = vld [vmem:[%s1729_s26 + $0x74] ss:$8 sps:$4 sm:$0xff]   ;;  %v1225_v3 = vld [vmem:[%s1729_s26 + $0x70] ss:$8 sps:$4 sm:$0xff]   ;;  %v1508_v4 = vmov 0   ;;  %v531_v22 = vlaneseq  ;;  %p1072_p0 = scmp.ne.s32.totalorder %s1577_s9, 1 }
  0x80   : > { %516 = vmatprep.mubr.bf16.mxu0 %v1508_v4  ;;  %484 = vmatprep.subr.bf16.mxu0 %v1223_v2  ;;  %v1226_v5 = vld [vmem:[%s1729_s26 + $0x64] ss:$8 sps:$4 sm:$0xff]   ;;  %v1228_v6 = vld [vmem:[%s1729_s26 + $0x60] ss:$8 sps:$4 sm:$0xff]   ;;  %v1229_v7 = vld [vmem:[%s1729_s26 + $0x54] ss:$8 sps:$4 sm:$0xff]  }
  0x81   : > { %485 = vmatpush1.bf16.msra.mxu0 %v1225_v3  ;;  %v1231_v8 = vld [vmem:[%s1729_s26 + $0x50] ss:$8 sps:$4 sm:$0xff]   ;;  %v1232_v9 = vld [vmem:[%s1729_s26 + $0x44] ss:$8 sps:$4 sm:$0xff]   ;;  %v1234_v10 = vld [vmem:[%s1729_s26 + $0x40] ss:$8 sps:$4 sm:$0xff]  }
  0x82   : > { %486 = vmatprep.subr.bf16.mxu0 %v1226_v5  ;;  %v1235_v11 = vld [vmem:[%s1729_s26 + $0x34] ss:$8 sps:$4 sm:$0xff]   ;;  %v1237_v12 = vld [vmem:[%s1729_s26 + $0x30] ss:$8 sps:$4 sm:$0xff]   ;;  %v1238_v13 = vld [vmem:[%s1729_s26 + $0x24] ss:$8 sps:$4 sm:$0xff]  }
  0x83   : > { %v1240_v14 = vld [vmem:[%s1729_s26 + $0x20] ss:$8 sps:$4 sm:$0xff]   ;;  %v1241_v15 = vld [vmem:[%s1729_s26 + $0x14] ss:$8 sps:$4 sm:$0xff]   ;;  %v1243_v16 = vld [vmem:[%s1729_s26 + $0x10] ss:$8 sps:$4 sm:$0xff]  }
  0x84   : > { %v1244_v17 = vld [vmem:[%s1729_s26 + $0x4] ss:$8 sps:$4 sm:$0xff]   ;;  %v1246_v18 = vld [vmem:[%s1729_s26] ss:$8 sps:$4 sm:$0xff]   ;;  %v387_v19 = vld [vmem:[%s326_s19] sm:$0x1] }
  0x85   : > { %487 = vmatpush1.bf16.msra.mxu0 %v1228_v6  ;;  %v1509_v20 = vmov 1966171168   ;;  %v1763_v24 = vshrl.u32 %v531_v22, 7  ;;  %v386_v31 = vld [vmem:[#allocation2] sm:$0x3]  ;;  %vm546_vm1 = vcmp.lt.s32.totalorder %v531_v22, 256 }
  0x86   : > { %488 = vmatprep.subr.bf16.mxu0 %v1229_v7  ;;  %v529_v21 = vunpack.c.l.s4 %v1509_v20 }
  0x88   : > { %v530_v23 = vunpack.c.0.s8 %v529_v21 }
  0x89   : > { %489 = vmatpush1.bf16.msra.mxu0 %v1231_v8 }
  0x8a   : > { %490 = vmatprep.subr.bf16.mxu0 %v1232_v9  ;;  %v1766_v26 = vsub.s32 %v530_v23, %v1763_v24 }
  0x8d   : > { %491 = vmatpush1.bf16.msra.mxu0 %v1234_v10 }
  0x8e   : > { %492 = vmatprep.subr.bf16.mxu0 %v1235_v11 }
  0x91   : > { %493 = vmatpush1.bf16.msra.mxu0 %v1237_v12 }
  0x92   : > { %494 = vmatprep.subr.bf16.mxu0 %v1238_v13 }
  0x95   : > { %495 = vmatpush1.bf16.msra.mxu0 %v1240_v14 }
  0x96   : > { %496 = vmatprep.subr.bf16.mxu0 %v1241_v15 }
  0x99   : > { %497 = vmatpush1.bf16.msra.mxu0 %v1243_v16 }
  0x9a   : > { %498 = vmatprep.subr.bf16.mxu0 %v1244_v17 }
  0x9d   : > { %499 = vmatpush1.bf16.msra.mxu0 %v1246_v18 }
  0xa0   : > { %517 = vmatmul.mubr.bf16.vlgmr.msra.gmra.mxu0 %v387_v19 }
 0x160   : > { %v518_v25 = vpop.f32.mrf.mxu0 }
 0x162   : > { %v520_v27 = vpop.f32.mrf.mxu0 }
 0x163   : > { %v527_v28 = vcombine.low %v518_v25, %v520_v27 }
 0x164   : > { %v522_v29 = vpop.f32.mrf.mxu0 }
 0x165   : > { %v534_v30 = vrot.slane %v527_v28, %v1766_v26 }
 0x166   : > { %v523_v32 = vpop.f32.mrf.mxu0 }
 0x167   : > { %v541_v33 = vrot.slane %v534_v30, %v1766_v26  ;;  %552 = sbr.rel (%p1072_p0) target bundleno = 807 (0x327), region = 72 }
 0x169   : > { %v543_v34 = vadd.f32 %v541_v33, %v386_v31 }
 0x16b   : > { %548 = vst.msk [vmem:[#allocation2] sm:$0x3] %vm546_vm1, %v543_v34 }
 0x16c   : > { %v1247_v35 = vld [vmem:[#allocation8 + $0x78] sm:$0xff]   ;;  %v1249_v37 = vld [vmem:[#allocation8 + $0x70] sm:$0xff]   ;;  %v1251_v39 = vld [vmem:[#allocation8 + $0x68] sm:$0xff]   ;;  %v564_v49 = vsub.s32 1, %v1763_v24  ;;  %v560_v60 = vsub.s32 0, %v1763_v24  ;;  %v1510_v13 = vmov 0  }
 0x16d   : > { %v1248_v36 = vld [vmem:[#allocation8 + $0x38] sm:$0xff]   ;;  %1114 = vmatprep.subr.bf16.mxu0 %v1247_v35  ;;  %v1250_v38 = vld [vmem:[#allocation8 + $0x30] sm:$0xff]   ;;  %v1252_v40 = vld [vmem:[#allocation8 + $0x28] sm:$0xff]   ;;  %882 = vmatprep.mubr.bf16.mxu1 %v1510_v13  ;;  %vm913_vm2 = vcmask 1040384   ;;  %vm914_vm3 = vsmask.f32 256 }
 0x16e   : > { %1115 = vmatpush3.bf16.msra.mxu0 %v1248_v36  ;;  %v1253_v41 = vld [vmem:[#allocation8 + $0x60] sm:$0xff]   ;;  %v1255_v43 = vld [vmem:[#allocation8 + $0x58] sm:$0xff]   ;;  %v1257_v45 = vld [vmem:[#allocation8 + $0x50] sm:$0xff]   ;;  %vm916_vm4 = vcmask 1041409   ;;  %vm917_vm5 = vsmask.f32 1280 }
 0x16f   : > { %1116 = vmatprep.subr.bf16.mxu0 %v1249_v37  ;;  %v1254_v42 = vld [vmem:[#allocation8 + $0x20] sm:$0xff]   ;;  %v1256_v44 = vld [vmem:[#allocation8 + $0x18] sm:$0xff]   ;;  %v1258_v53 = vld [vmem:[#allocation8 + $0x10] sm:$0xff]  }
 0x170   : > { %v554_v47 = vld [vmem:[%s1826_s2] sm:$0x3]  ;;  %v1265_v51 = vld [vmem:[#allocation9 + $0x70] ss:$8 sps:$4 sm:$0xff]   ;;  %v1266_v52 = vld [vmem:[#allocation9 + $0x64] ss:$8 sps:$4 sm:$0xff]  }
 0x171   : > { %v1263_v50 = vld [vmem:[#allocation9 + $0x74] ss:$8 sps:$4 sm:$0xff]   ;;  %v1259_v55 = vld [vmem:[#allocation8 + $0x48] sm:$0xff]   ;;  %v1261_v61 = vld [vmem:[#allocation8 + $0x40] sm:$0xff]  }
 0x172   : > { %1117 = vmatpush3.bf16.msra.mxu0 %v1250_v38  ;;  %v553_v46 = vld [vmem:[#allocation2] sm:$0x3]  ;;  %850 = vmatprep.subr.bf16.mxu1 %v1263_v50  ;;  %v1268_v56 = vld [vmem:[#allocation9 + $0x60] ss:$8 sps:$4 sm:$0xff]   ;;  %v1271_v63 = vld [vmem:[#allocation9 + $0x50] ss:$8 sps:$4 sm:$0xff]  }
 0x173   : > { %1118 = vmatprep.subr.bf16.mxu0 %v1251_v39  ;;  %v555_v48 = vadd.f32 %v554_v47, %v553_v46  ;;  %851 = vmatpush1.bf16.msra.mxu1 %v1265_v51  ;;  %v1269_v58 = vld [vmem:[#allocation9 + $0x54] ss:$8 sps:$4 sm:$0xff]   ;;  %v1260_v59 = vld [vmem:[#allocation8 + $0x8] sm:$0xff]   ;;  %v1262_v2 = vld [vmem:[#allocation8] sm:$0xff]  }
 0x174   : > { %852 = vmatprep.subr.bf16.mxu1 %v1266_v52  ;;  %v1272_v0 = vld [vmem:[#allocation9 + $0x44] ss:$8 sps:$4 sm:$0xff]   ;;  %v1274_v3 = vld [vmem:[#allocation9 + $0x40] ss:$8 sps:$4 sm:$0xff]   ;;  %v1275_v4 = vld [vmem:[#allocation9 + $0x34] ss:$8 sps:$4 sm:$0xff]  }
 0x175   : > { %v556_v54 = vmax.f32 %v555_v48, 0.0  ;;  %v1277_v6 = vld [vmem:[#allocation9 + $0x30] ss:$8 sps:$4 sm:$0xff]   ;;  %v1278_v7 = vld [vmem:[#allocation9 + $0x24] ss:$8 sps:$4 sm:$0xff]   ;;  %vm915_vm6 = vmand %vm913_vm2, %vm914_vm3 }
 0x176   : > { %1119 = vmatpush3.bf16.msra.mxu0 %v1252_v40  ;;  %v1280_v8 = vld [vmem:[#allocation9 + $0x20] ss:$8 sps:$4 sm:$0xff]   ;;  %v1281_v9 = vld [vmem:[#allocation9 + $0x14] ss:$8 sps:$4 sm:$0xff]   ;;  %v1283_v10 = vld [vmem:[#allocation9 + $0x10] ss:$8 sps:$4 sm:$0xff]  }
 0x177   : > { %1120 = vmatprep.subr.bf16.mxu0 %v1253_v41  ;;  %v565_v57 = vrot.slane %v556_v54, %v564_v49  ;;  %853 = vmatpush1.bf16.msra.mxu1 %v1268_v56  ;;  %v561_v1 = vrot.slane %v556_v54, %v560_v60  ;;  %v1284_v11 = vld [vmem:[#allocation9 + $0x4] ss:$8 sps:$4 sm:$0xff]   ;;  %v1286_v12 = vld [vmem:[#allocation9] ss:$8 sps:$4 sm:$0xff]   ;;  %v602_v15 = vld [vmem:[%s1828_s4] sm:$0x1] }
 0x178   : > { %854 = vmatprep.subr.bf16.mxu1 %v1269_v58  ;;  %v758_v23 = vld [vmem:[%s1830_s6] sm:$0x3]  ;;  %vm918_vm7 = vmand %vm916_vm4, %vm917_vm5  ;;  %v920_v24 = vld [vmem:[#allocation12] sm:$0x3] }
 0x179   : > { %v569_v62 = vpack.c.bf16 %v565_v57, %v565_v57  ;;  %v568_v5 = vpack.c.bf16 %v561_v1, %v561_v1  ;;  %v843_v25 = vrot.slane %v758_v23, %v560_v60  ;;  %v847_v27 = vrot.slane %v758_v23, %v564_v49  ;;  %vm919_vm8 = vmor %vm918_vm7, %vm915_vm6 }
 0x17a   : > { %1121 = vmatpush3.bf16.msra.mxu0 %v1254_v42 }
 0x17b   : > { %1122 = vmatprep.subr.bf16.mxu0 %v1255_v43  ;;  %731 = vmatprep.mubr.bf16.mxu0 %v569_v62 }
 0x17c   : > { %855 = vmatpush1.bf16.msra.mxu1 %v1271_v63 }
 0x17d   : > { %856 = vmatprep.subr.bf16.mxu1 %v1272_v0 }
 0x17e   : > { %1123 = vmatpush3.bf16.msra.mxu0 %v1256_v44 }
 0x17f   : > { %1124 = vmatprep.subr.bf16.mxu0 %v1257_v45 }
 0x180   : > { %857 = vmatpush1.bf16.msra.mxu1 %v1274_v3 }
 0x181   : > { %858 = vmatprep.subr.bf16.mxu1 %v1275_v4 }
 0x182   : > { %1125 = vmatpush3.bf16.msra.mxu0 %v1258_v53 }
 0x183   : > { %1126 = vmatprep.subr.bf16.mxu0 %v1259_v55 }
 0x184   : > { %859 = vmatpush1.bf16.msra.mxu1 %v1277_v6 }
 0x185   : > { %860 = vmatprep.subr.bf16.mxu1 %v1278_v7 }
 0x186   : > { %1127 = vmatpush3.bf16.msra.mxu0 %v1260_v59 }
 0x187   : > { %1128 = vmatprep.subr.bf16.mxu0 %v1261_v61 }
 0x188   : > { %861 = vmatpush1.bf16.msra.mxu1 %v1280_v8 }
 0x189   : > { %862 = vmatprep.subr.bf16.mxu1 %v1281_v9 }
 0x18a   : > { %1129 = vmatpush3.bf16.msra.mxu0 %v1262_v2 }
 0x18c   : > { %863 = vmatpush1.bf16.msra.mxu1 %v1283_v10 }
 0x18d   : > { %732 = vmatmul.mubr.bf16.vlgmr.msra.gmra.mxu0 %v568_v5  ;;  %864 = vmatprep.subr.bf16.mxu1 %v1284_v11 }
 0x190   : > { %865 = vmatpush1.bf16.msra.mxu1 %v1286_v12 }
 0x24d   : > { %v1130_v14 = vpop.f32.mrf.mxu0 }
 0x24f   : > { %v1131_v16 = vpop.f32.mrf.mxu0 }
 0x250   : > { %v1132_v17 = vadd.f32 %v1131_v16, %v1130_v14 }
 0x251   : > { %v1133_v18 = vpop.f32.mrf.mxu0 }
 0x252   : > { %v734_v19 = vadd.f32 %v1132_v17, %v602_v15 }
 0x253   : > { %v1134_v20 = vpop.f32.mrf.mxu0 }
 0x254   : > { %739 = vst [vmem:[#allocation11] sm:$0x1] %v734_v19  ;;  %v740_v21 = vmax.f32 %v734_v19, 0.0 }
 0x256   : > { %v741_v22 = vpack.c.bf16 %v740_v21, %v740_v21 }
 0x258   : > { %883 = vmatmul.mubr.bf16.vlgmr.msra.gmra.mxu1 %v741_v22 }
 0x318   : > { %v884_v28 = vpop.f32.mrf.mxu1 }
 0x319   : > { %v885_v29 = vadd.f32 %v884_v28, %v843_v25 }
 0x31a   : > { %v886_v30 = vpop.f32.mrf.mxu1 }
 0x31b   : > { %v887_v31 = vadd.f32 %v886_v30, %v847_v27  ;;  %v891_v33 = vmax.f32 %v885_v29, 0.0 }
 0x31c   : > { %v888_v32 = vpop.f32.mrf.mxu1 }
 0x31d   : > { %v892_v34 = vmax.f32 %v887_v31, 0.0 }
 0x31e   : > { %v889_v35 = vpop.f32.mrf.mxu1 }
 0x31f   : > { %v1105_v36 = vpack.c.bf16 %v892_v34, %v891_v33 }
 0x321   : > { %v904_v37 = vrot.slane %v1105_v36, %v1766_v26 }
 0x323   : > { %v911_v38 = vrot.slane %v904_v37, %v1766_v26 }
 0x325   : > { %v921_v39 = vsel %vm919_vm8, %v911_v38, %v920_v24 }
 0x326   : > { %922 = vst [vmem:[#allocation12] sm:$0x3] %v921_v39 }
 0x327 PF: > { %p1175_p2 = scmp.eq.s32.totalorder %s1577_s9, 1  ;;  %s1511_s23 = smov [#allocation11]  }
 0x328   : > { %s930_s18 = sshll.u32 %s1511_s23, 4  ;;  %s1512_s20 = smov [#allocation12]   ;;  %s931_s18 = int_to_ptr.vmem [resolvable:$true] %s930_s18 }
 0x329   : > { %s941_s0 = sshll.u32 %s1512_s20, 4  ;;  %s1395_s24 = scalar_lea.vmem %s931_s18, 16  ;;  %s942_s0 = int_to_ptr.vmem [resolvable:$true] %s941_s0 }
 0x32a   : > { %p1396_p3 = scmp.ne.s32.totalorder %s931_s18, %s1395_s24  ;;  %s1401_s17 = scalar_lea.vmem %s931_s18, 32 }
 0x32b   : > { %p1402_p5 = scmp.lt.s32.totalorder %s931_s18, %s931_s18  ;;  %p1403_p11 = scmp.lt.s32.totalorder %s1401_s17, %s1395_s24 }
 0x32c   : > { %p1397_p10 = pnand %p1396_p3, %p1175_p2 }
 0x32d   : > { %p1404_p1 = por %p1403_p11, %p1402_p5 }
 0x32e   : > { %p1398_p13 = pneg %p1397_p10 }
 0x330   : > { %p1405_p7 = pnand %p1404_p1, %p1398_p13 }
 0x332   : > { %1408 = shalt.err (!%p1405_p7)
}
 0x333   : > { %1149 = dma.vmem_to_hbm [thread:$0]  (%p1175_p2), %s931_s18, 16, %s1831_s7, [#allocation5]  }
 0x334   : > { %s1419_s22 = scalar_lea.vmem %s942_s0, 32  ;;  %p1426_p4 = scmp.lt.s32.totalorder %s942_s0, %s942_s0 }
 0x335   : > { %p1420_p6 = scmp.ne.s32.totalorder %s942_s0, %s1419_s22  ;;  %p1427_p9 = scmp.lt.s32.totalorder %s1419_s22, %s1419_s22 }
 0x337   : > { %p1421_p8 = pnand %p1420_p6, %p1175_p2  ;;  %p1428_p0 = por %p1427_p9, %p1426_p4 }
 0x339   : > { %p1422_p12 = pneg %p1421_p8 }
 0x33b   : > { %p1429_p3 = pnand %p1428_p0, %p1422_p12 }
 0x33d   : > { %1432 = shalt.err (!%p1429_p3)
}
 0x33e   : > { %1151 = dma.vmem_to_hbm [thread:$0]  (%p1175_p2), %s942_s0, 32, %s1832_s8, [#allocation13]  }
 0x33f   : > { %1476 = dma.done.wait (%p1175_p2), [#allocation5], 16  }
 0x340   : > { %1478 = vsyncadd (%p1175_p2), [#allocation5], 4294967280 }
 0x341   : > { %1480 = dma.done.wait (%p1175_p2), [#allocation13], 32  }
 0x342   : > { %1482 = vsyncadd (%p1175_p2), [#allocation13], 4294967264 }
 0x343 PF: > { %s1852_s26 = smov %s1624_s27  ;;  %p25_p10 = scmp.ge.s32.totalorder %s1624_s27, 4  }
 0x344   : > { %s1853_s27 = smov %s1489_s28  ;;  %s1854_s28 = smov %s1493_s29 }
 0x345   : > { %s1855_s29 = smov %s1633_s15  ;;  %s1856_s30 = smov %s1852_s26 }
 0x346   :  { %27 = sbr.rel (!%p25_p10) target bundleno = 10 (0xa), region = 122 }
 0x34b   :  { %958 = vsyncpa [#allocation4], 1 }
 0x34c   :  { %960 = vsyncpa [#allocation4 + $0x1], 1 }
 0x34d   :  { %961 = vsyncpa [#allocation7], 1 }
 0x34e   :  { %963 = vsyncpa [#allocation7 + $0x1], 1 }
 0x34f   :  { %964 = vsyncpa [#allocation10], 1 }
 0x350   :  { %965 = vsyncpa [#allocation5], 1 }
 0x351   :  { %967 = vsyncpa [#allocation5 + $0x1], 1 }
 0x352   :  { %968 = vsyncpa [#allocation13], 1 }

</bundles_post_ra>
